<compile_context>
chip_gen: v7x
topology: tpu7x:2x2x1
jax: 0.10.0
libtpu: 0.0.40
codegen_flags: <defaults>
</compile_context>

<pallas_src>
import jax
import jax.numpy as jnp
from jax.experimental import pallas as pl
from jax.experimental.pallas import tpu as pltpu

_LANE = 128


def _mlp_kernel(x_ref, w1_ref, b1_ref, w2_ref, b2_ref, o_ref):
    # hidden = relu(x @ W1 + b1)   -- MXU matmul, f32 accumulation
    h = jnp.dot(x_ref[...], w1_ref[...], preferred_element_type=jnp.float32)
    h = jnp.maximum(h + b1_ref[...], 0.0)          # b1 is (1, H): broadcasts over rows
    # out = hidden @ W2p + b2p     -- W2/b2 zero-padded to a lane-dense 128-wide slab
    o = jnp.dot(h, w2_ref[...], preferred_element_type=jnp.float32)
    o_ref[...] = (o + b2_ref[...]).astype(o_ref.dtype)


def _cost(rows, F, H, Op):
    return pl.CostEstimate(
        flops=2 * rows * F * H + 2 * rows * H * Op,
        transcendentals=0,
        bytes_accessed=4 * (rows * F + F * H + H + H * Op + Op + rows * Op),
    )


def _tiled_vmem_bytes(tm, F, H, Op):
    itemsize = 4
    weights = 2 * itemsize * (F * H + H + H * Op + Op)   # pipeliner double-buffers
    xbuf = 2 * itemsize * tm * F                          # double-buffered x tile
    obuf = 2 * itemsize * tm * Op                         # double-buffered out tile
    return weights + xbuf + obuf


def _gridless_call(xi, w1, b1_2d, w2p, b2p, Op):
    # Single-shot path: no grid, no pipeline machinery; everything sits in VMEM.
    Bi, F = xi.shape
    H = w1.shape[1]
    return pl.pallas_call(
        _mlp_kernel,
        out_shape=jax.ShapeDtypeStruct((Bi, Op), xi.dtype),
        in_specs=[pl.BlockSpec(memory_space=pltpu.MemorySpace.VMEM)] * 5,
        out_specs=pl.BlockSpec(memory_space=pltpu.MemorySpace.VMEM),
        cost_estimate=_cost(Bi, F, H, Op),
    )(xi, w1, b1_2d, w2p, b2p)


def _tiled_call(xi, w1, b1_2d, w2p, b2p, Op, tm):
    # Batch-only tiling; weights/biases stay VMEM-resident (constant index_map).
    Bi, F = xi.shape
    H = w1.shape[1]
    n_tiles = Bi // tm
    vmem_limit = min(_tiled_vmem_bytes(tm, F, H, Op) + (4 << 20), 48 << 20)
    return pl.pallas_call(
        _mlp_kernel,
        out_shape=jax.ShapeDtypeStruct((Bi, Op), xi.dtype),
        grid=(n_tiles,),
        in_specs=[
            pl.BlockSpec((tm, F), lambda i: (i, 0)),   # x: tiled over batch
            pl.BlockSpec((F, H), lambda i: (0, 0)),    # W1: VMEM-resident
            pl.BlockSpec((1, H), lambda i: (0, 0)),    # b1: VMEM-resident
            pl.BlockSpec((H, Op), lambda i: (0, 0)),   # W2 (padded): VMEM-resident
            pl.BlockSpec((1, Op), lambda i: (0, 0)),   # b2 (padded): VMEM-resident
        ],
        out_specs=pl.BlockSpec((tm, Op), lambda i: (i, 0)),
        compiler_params=pltpu.CompilerParams(
            dimension_semantics=("parallel",),         # v7x 2-TC sharding of batch tiles
            vmem_limit_bytes=vmem_limit,
        ),
        cost_estimate=_cost(Bi, F, H, Op),
    )(xi, w1, b1_2d, w2p, b2p)


def net_forward(x, w1, b1, w2, b2, *, tm=4096):
    """x: (B, F); w1: (F, H); b1: (H,); w2: (H, O); b2: (O,)  ->  (B, O).

    Weights are stored as [in, out] (the transpose of PyTorch Linear.weight)
    so both matmuls map directly onto the MXU as x @ W.
    """
    B, F = x.shape
    H = w1.shape[1]
    O = w2.shape[1]

    # Lane-dense output slab: pad the output dim up to a multiple of 128.
    Op = max(_LANE, pl.cdiv(O, _LANE) * _LANE)
    w2p = w2 if Op == O else jnp.pad(w2, ((0, 0), (0, Op - O)))
    b2p = (b2 if Op == O else jnp.pad(b2, (0, Op - O))).reshape(1, Op)
    b1_2d = b1.reshape(1, H)

    # VMEM budget guard (v7x: 64 MiB physical; v5e: 16 MiB scoped default).
    while tm > 256 and _tiled_vmem_bytes(tm, F, H, Op) > (24 << 20):
        tm //= 2

    if B <= tm:
        return _gridless_call(x, w1, b1_2d, w2p, b2p, Op)[:, :O]

    n_full = B // tm
    b_main = n_full * tm
    rem = B - b_main
    # No jnp.pad of x: pass x through unchanged when it tiles evenly, otherwise
    # slice off the ragged tail and run it through the gridless path.
    x_main = x if rem == 0 else x[:b_main]
    out_main = _tiled_call(x_main, w1, b1_2d, w2p, b2p, Op, tm)
    if rem == 0:
        return out_main[:, :O]
    out_rem = _gridless_call(x[b_main:], w1, b1_2d, w2p, b2p, Op)
    return jnp.concatenate([out_main, out_rem], axis=0)[:, :O]


if __name__ == "__main__":
    # Net(n_feature=8, n_hidden=32, n_output=4), batch=2 (demo shapes)
    n_feature, n_hidden, n_output = 8, 32, 4
    batch = 2

    key = jax.random.PRNGKey(0)
    kx, k1, k2, k3, k4, kmid, kbig = jax.random.split(key, 7)

    x = jax.random.normal(kx, (batch, n_feature), dtype=jnp.float32)
    # Params constructed directly in (in, out) layout (PyTorch Linear.weight.T).
    w1 = jax.random.normal(k1, (n_feature, n_hidden), dtype=jnp.float32) * 0.1
    b1 = jax.random.normal(k2, (n_hidden,), dtype=jnp.float32) * 0.1
    w2 = jax.random.normal(k3, (n_hidden, n_output), dtype=jnp.float32) * 0.1
    b2 = jax.random.normal(k4, (n_output,), dtype=jnp.float32) * 0.1

    def ref_fn(xi):
        return jnp.maximum(xi @ w1 + b1, 0.0) @ w2 + b2

    # --- tiny batch: gridless path ---
    out = net_forward(x, w1, b1, w2, b2)
    jax.block_until_ready(out)
    assert out.shape == (batch, n_output)
    assert jnp.allclose(out, ref_fn(x), atol=1e-5, rtol=1e-5)

    # --- medium batch: still gridless at default tm=4096 (per review) ---
    x_mid = jax.random.normal(kmid, (1024, n_feature), dtype=jnp.float32)
    out_mid = net_forward(x_mid, w1, b1, w2, b2)
    jax.block_until_ready(out_mid)
    assert out_mid.shape == (1024, n_output)
    assert jnp.allclose(out_mid, ref_fn(x_mid), atol=1e-3, rtol=1e-3)

    # --- large ragged batch: tiled path (2 full tiles -> even split across
    #     v7x's 2 TCs) + 37-row remainder through the gridless path, no pad ---
    big_batch = 2 * 2048 + 37
    xb = jax.random.normal(kbig, (big_batch, n_feature), dtype=jnp.float32)
    out_b = net_forward(xb, w1, b1, w2, b2, tm=2048)
    jax.block_until_ready(out_b)
    assert out_b.shape == (big_batch, n_output)
    assert jnp.allclose(out_b, ref_fn(xb), atol=1e-3, rtol=1e-3)

    print("KERNEL_OK")
</pallas_src>

<mosaic_0001>
module attributes {stable_mosaic.version = 11 : i64} {
  func.func @_mlp_kernel(%arg0: memref<2x8xf32, #tpu.memory_space<vmem>>, %arg1: memref<8x32xf32, #tpu.memory_space<vmem>>, %arg2: memref<1x32xf32, #tpu.memory_space<vmem>>, %arg3: memref<32x128xf32, #tpu.memory_space<vmem>>, %arg4: memref<1x128xf32, #tpu.memory_space<vmem>>, %arg5: memref<2x128xf32, #tpu.memory_space<vmem>>) attributes {dimension_semantics = [], scalar_prefetch = 0 : i64, scratch_operands = 0 : i64, tpu.core_type = #tpu.core_type<tc>} {
    %c0 = arith.constant 0 : index
    %c0_0 = arith.constant 0 : index
    %0 = vector.load %arg0[%c0, %c0_0] : memref<2x8xf32, #tpu.memory_space<vmem>>, vector<2x8xf32>
    %c0_1 = arith.constant 0 : index
    %c0_2 = arith.constant 0 : index
    %1 = vector.load %arg1[%c0_1, %c0_2] : memref<8x32xf32, #tpu.memory_space<vmem>>, vector<8x32xf32>
    %cst = arith.constant dense<0.000000e+00> : vector<2x32xf32>
    %2 = tpu.matmul %0, %1, %cst {dimension_numbers = #tpu.dot_dimension_numbers<[1], [0], [0], [1], [0, 0, 1, 1], [], []>} : vector<2x8xf32>, vector<8x32xf32>, vector<2x32xf32> -> vector<2x32xf32>
    %c0_3 = arith.constant 0 : index
    %c0_4 = arith.constant 0 : index
    %3 = vector.load %arg2[%c0_3, %c0_4] : memref<1x32xf32, #tpu.memory_space<vmem>>, vector<1x32xf32>
    %4 = vector.broadcast %3 : vector<1x32xf32> to vector<2x32xf32>
    %5 = arith.addf %2, %4 : vector<2x32xf32>
    %cst_5 = arith.constant 0.000000e+00 : f32
    %6 = vector.broadcast %cst_5 : f32 to vector<2x32xf32>
    %7 = arith.maximumf %5, %6 : vector<2x32xf32>
    %c0_6 = arith.constant 0 : index
    %c0_7 = arith.constant 0 : index
    %8 = vector.load %arg3[%c0_6, %c0_7] : memref<32x128xf32, #tpu.memory_space<vmem>>, vector<32x128xf32>
    %cst_8 = arith.constant dense<0.000000e+00> : vector<2x128xf32>
    %9 = tpu.matmul %7, %8, %cst_8 {dimension_numbers = #tpu.dot_dimension_numbers<[1], [0], [0], [1], [0, 0, 1, 1], [], []>} : vector<2x32xf32>, vector<32x128xf32>, vector<2x128xf32> -> vector<2x128xf32>
    %c0_9 = arith.constant 0 : index
    %c0_10 = arith.constant 0 : index
    %10 = vector.load %arg4[%c0_9, %c0_10] : memref<1x128xf32, #tpu.memory_space<vmem>>, vector<1x128xf32>
    %11 = vector.broadcast %10 : vector<1x128xf32> to vector<2x128xf32>
    %12 = arith.addf %9, %11 : vector<2x128xf32>
    %c0_11 = arith.constant 0 : index
    %c0_12 = arith.constant 0 : index
    %13 = vector.load %arg5[%c0_11, %c0_12] : memref<2x128xf32, #tpu.memory_space<vmem>>, vector<2x128xf32>
    tpu.vector_store %arg5[%c0_11, %c0_12], %12 {strides = array<i32>} : memref<2x128xf32, #tpu.memory_space<vmem>>, vector<2x128xf32>,
    return
  }
}

</mosaic_0001>

<bundles_post_ra>
// kernel: tpu_custom_call.1
= control target key start
LH: loop header
LB: loop body
LE: loop exit
PB: predicated region body
PF: predicated region fallthrough
CT: control target
= control target key end

     0   :  { %10 = vsyncpa [#allocation3], 0  ;;  %s473_s0 = inlined_call_operand.hbm [shape: f32[2,8], index: 0, kind: input, shape index: {}]   ;;  %s474_s1 = inlined_call_operand.hbm [shape: f32[8,32], index: 1, kind: input, shape index: {}]   ;;  %s475_s2 = inlined_call_operand.vmem [shape: f32[1,32], index: 2, kind: input, shape index: {}]   ;;  %s476_s3 = inlined_call_operand.hbm [shape: f32[32,128], index: 3, kind: input, shape index: {}]   ;;  %s477_s4 = inlined_call_operand.vmem [shape: f32[1,128], index: 4, kind: input, shape index: {}]   ;;  %s478_s5 = inlined_call_operand.hbm [shape: f32[2,128], index: 5, kind: output, shape index: {}]  }
   0x1   :  { %11 = vsyncpa [#allocation6], 0 }
   0x2   :  { %12 = vsyncpa [#allocation4], 0  ;;  %s380_s18 = smov [#allocation5]   ;;  %s381_s20 = smov [#allocation2]  }
   0x3   :  { %s29_s19 = sshll.u32 %s380_s18, 4  ;;  %s19_s21 = sshll.u32 %s381_s20, 4  ;;  %s30_s19 = int_to_ptr.vmem [resolvable:$true] %s29_s19  ;;  %s20_s21 = int_to_ptr.vmem [resolvable:$true] %s19_s21 }
   0x4   :  { %s286_s24 = scalar_lea.hbm %s474_s1, 128 }
   0x5   :  { %p287_p0 = scmp.ne.s32.totalorder %s474_s1, %s286_s24  ;;  %p290_p1 = scmp.lt.u32.totalorder %s286_s24, %s474_s1 }
   0x7   :  { %p292_p2 = pnand %p290_p1, %p287_p0 }
   0x9   :  { %295 = shalt.err (!%p292_p2)
}
   0xa   :  { %s296_s29 = scalar_lea.vmem %s30_s19, 128  ;;  %p301_p4 = scmp.lt.s32.totalorder %s30_s19, %s30_s19 }
   0xb   :  { %p297_p3 = scmp.ne.s32.totalorder %s30_s19, %s296_s29  ;;  %p302_p5 = scmp.lt.s32.totalorder %s296_s29, %s296_s29 }
   0xd   :  { %p303_p6 = por %p302_p5, %p301_p4 }
   0xf   :  { %p304_p7 = pnand %p303_p6, %p297_p3 }
  0x11   :  { %307 = shalt.err (!%p304_p7)
}
  0x12   :  { %32 = dma.hbm_to_vmem [thread:$0]  %s474_s1, 128, %s30_s19, [#allocation6]  }
  0x13   :  { %s308_s9 = scalar_lea.hbm %s473_s0, 32 }
  0x14   :  { %p309_p8 = scmp.ne.s32.totalorder %s473_s0, %s308_s9  ;;  %p312_p9 = scmp.lt.u32.totalorder %s308_s9, %s473_s0 }
  0x16   :  { %p314_p10 = pnand %p312_p9, %p309_p8 }
  0x18   :  { %317 = shalt.err (!%p314_p10)
}
  0x19   :  { %s318_s14 = scalar_lea.vmem %s20_s21, 32  ;;  %p323_p12 = scmp.lt.s32.totalorder %s20_s21, %s20_s21 }
  0x1a   :  { %p319_p11 = scmp.ne.s32.totalorder %s20_s21, %s318_s14  ;;  %p324_p13 = scmp.lt.s32.totalorder %s318_s14, %s318_s14 }
  0x1c   :  { %p325_p0 = por %p324_p13, %p323_p12 }
  0x1e   :  { %p326_p1 = pnand %p325_p0, %p319_p11 }
  0x20   :  { %329 = shalt.err (!%p326_p1)
}
  0x21   :  { %22 = dma.hbm_to_vmem [thread:$0]  %s473_s0, 32, %s20_s21, [#allocation3]  }
  0x22   :  { %s382_s16 = smov [#allocation7]   ;;  %s330_s20 = scalar_lea.hbm %s476_s3, 512 }
  0x23   :  { %s40_s17 = sshll.u32 %s382_s16, 4  ;;  %p331_p2 = scmp.ne.s32.totalorder %s476_s3, %s330_s20  ;;  %s41_s17 = int_to_ptr.vmem [resolvable:$true] %s40_s17 }
  0x24   :  { %p334_p3 = scmp.lt.u32.totalorder %s330_s20, %s476_s3 }
  0x26   :  { %p336_p4 = pnand %p334_p3, %p331_p2 }
  0x28   :  { %339 = shalt.err (!%p336_p4)
}
  0x29   :  { %s340_s26 = scalar_lea.vmem %s41_s17, 512  ;;  %p345_p6 = scmp.lt.s32.totalorder %s41_s17, %s41_s17 }
  0x2a   :  { %p341_p5 = scmp.ne.s32.totalorder %s41_s17, %s340_s26  ;;  %p346_p7 = scmp.lt.s32.totalorder %s340_s26, %s340_s26 }
  0x2c   :  { %p347_p8 = por %p346_p7, %p345_p6 }
  0x2e   :  { %p348_p9 = pnand %p347_p8, %p341_p5 }
  0x30   :  { %351 = shalt.err (!%p348_p9)
}
  0x31   :  { %s383_s0 = smov 128   ;;  %s384_s21 = smov 8  }
  0x32   :  { %46 = dma.hbm_to_vmem [thread:$0]  %s476_s3, 512, %s41_s17, [#allocation6], %s383_s0, %s383_s0, %s384_s21  }
  0x33   :  { %374 = dma.done.wait [#allocation3], 32  }
  0x34   :  { %375 = vsyncadd [#allocation3], 4294967264 }
  0x35   :  { %376 = dma.done.wait [#allocation6], 640  }
  0x36   :  { %377 = vsyncadd [#allocation6], 4294966656  ;;  %v385_v0 = vmov 0.0   ;;  %vm386_vm0 = vmmov 0   ;;  %v387_v1 = vmov 0.0|0.0   ;;  %vm67_vm1 = vcmask 64512  }
  0x37   :  { %255 = vmatprep.subr.mxu0 %v385_v0  ;;  %257 = vmatprep.mubr.msk.f32.mxu0 %vm386_vm0, %v385_v0  ;;  %v59_v2 = vld [vmem:[#allocation5] sm:$0xff]  ;;  %v58_v3 = vld [vmem:[#allocation2] sm:$0x3]  ;;  %v142_v4 = vld [vmem:[#allocation7] sm:$0xff]  ;;  %vm153_vm2 = vcmask 261120   ;;  %s388_s7 = smov [#allocation8]  }
  0x38   :  { %271 = vmatprep.subr.bf16.mxu1 %v387_v1  ;;  %268 = vmatprep.mubr.msk.f32.mxu1 %vm386_vm0, %v385_v0  ;;  %v143_v5 = vld [vmem:[#allocation7 + $0x8] sm:$0xff]  ;;  %v144_v7 = vld [vmem:[#allocation7 + $0x10] sm:$0xff]  ;;  %v145_v8 = vld [vmem:[#allocation7 + $0x18] sm:$0xff]  ;;  %s234_s8 = sshll.u32 %s388_s7, 4  ;;  %s235_s8 = int_to_ptr.vmem [resolvable:$true] %s234_s8 }
  0x39   :  { %256 = vmatpush3.msra.mxu0 %v59_v2  ;;  %v272_v6 = vpack.c.bf16 %v143_v5, %v142_v4  ;;  %v275_v9 = vpack.c.bf16 %v145_v8, %v144_v7  ;;  %v244_v10 = vld [vmem:[%s475_s2] ss:$0 sm:$0xff]  ;;  %s352_s9 = scalar_lea.vmem %s235_s8, 32  ;;  %p357_p11 = scmp.lt.s32.totalorder %s235_s8, %s235_s8 }
  0x3a   :  { %258 = vmatmul.mubr.msk.f32.vlgmr.msra.gmra.mrb[0].mxu0 %vm67_vm1, %v58_v3  ;;  %v246_v15 = vld [vmem:[%s477_s4] ss:$0 sm:$0xff]  ;;  %p353_p10 = scmp.ne.s32.totalorder %s235_s8, %s352_s9  ;;  %p358_p12 = scmp.lt.s32.totalorder %s352_s9, %s352_s9 }
  0x3b   :  { %273 = vmatpush3.bf16.msra.mxu1 %v272_v6 }
  0x3c   :  { %274 = vmatprep.subr.bf16.mxu1 %v387_v1  ;;  %p359_p13 = por %p358_p12, %p357_p11 }
  0x3e   :  { %p360_p0 = pnand %p359_p13, %p353_p10 }
  0x3f   :  { %276 = vmatpush3.bf16.msra.mxu1 %v275_v9 }
 0x10d   :  { %v137_v11 = vpop.f32.mrb[0].mxu0 }
 0x10e   :  { %v138_v12 = vadd.f32 %v244_v10, %v137_v11  ;;  %v259_v13 = vpop.f32.mrb[1].mxu0 }
 0x110   :  { %v141_v14 = vmax.f32 %v138_v12, 0.0 }
 0x112   :  { %269 = vmatmul.mubr.msk.f32.vlgmr.msra.gmra.mrb[0].mxu1 %vm153_vm2, %v141_v14 }
 0x1e5   :  { %v223_v16 = vpop.f32.mrb[0].mxu1 }
 0x1e6   :  { %v224_v17 = vadd.f32 %v246_v15, %v223_v16  ;;  %v270_v18 = vpop.f32.mrb[1].mxu1 }
 0x1e8   :  { %227 = vst [vmem:[#allocation8] sm:$0x3] %v224_v17 }
 0x1e9   :  { %363 = shalt.err (!%p360_p0)
}
 0x1ea   :  { %s364_s11 = scalar_lea.hbm %s478_s5, 32 }
 0x1eb   :  { %p365_p1 = scmp.ne.s32.totalorder %s478_s5, %s364_s11  ;;  %p368_p2 = scmp.lt.u32.totalorder %s364_s11, %s478_s5 }
 0x1ed   :  { %p370_p3 = pnand %p368_p2, %p365_p1 }
 0x1ef   :  { %373 = shalt.err (!%p370_p3)
}
 0x1f0   :  { %237 = dma.vmem_to_hbm [thread:$0]  %s235_s8, 32, %s478_s5, [#allocation4]  }
 0x1f1   :  { %378 = dma.done.wait [#allocation4], 32  }
 0x1f2   :  { %379 = vsyncadd [#allocation4], 4294967264 }
 0x1f3   :  { %241 = vsyncpa [#allocation3], 1 }
 0x1f4   :  { %242 = vsyncpa [#allocation6], 1 }
 0x1f5   :  { %243 = vsyncpa [#allocation4], 1 }

</bundles_post_ra>
